<compile_context>
chip_gen: v7x
topology: tpu7x:2x2x1
jax: 0.10.0
libtpu: 0.0.40
codegen_flags: <defaults>
</compile_context>

<pallas_src>
import functools
import math

import jax
import jax.numpy as jnp
from jax.experimental import pallas as pl
from jax.experimental.pallas import tpu as pltpu


VMEM_LIMIT_BYTES = 48 * 1024 * 1024  # safe on v7x (64 MiB physical), plenty on v5e/v6e


# ---------------------------------------------------------------------------
# Pass-1 kernels: support = x @ W^T + b
# ---------------------------------------------------------------------------

def _support_kernel_single(x_ref, wt_ref, b_ref, o_ref):
    # Whole feature reduction in one shot (Fin small enough to fit VMEM tiles).
    acc = jnp.dot(x_ref[...].astype(jnp.bfloat16),
                  wt_ref[...].astype(jnp.bfloat16),
                  preferred_element_type=jnp.float32)
    o_ref[...] = (acc + b_ref[...]).astype(o_ref.dtype)


def _support_kernel_reduce(x_ref, wt_ref, b_ref, o_ref, acc_ref):
    # Feature reduction tiled as the LAST grid axis (for very wide Fin).
    k = pl.program_id(2)

    @pl.when(k == 0)
    def _():
        acc_ref[...] = jnp.zeros_like(acc_ref)

    acc_ref[...] += jnp.dot(x_ref[...].astype(jnp.bfloat16),
                            wt_ref[...].astype(jnp.bfloat16),
                            preferred_element_type=jnp.float32)

    @pl.when(k == pl.num_programs(2) - 1)
    def _():
        o_ref[...] = (acc_ref[...] + b_ref[...]).astype(o_ref.dtype)


# ---------------------------------------------------------------------------
# Pass-2 kernels: output = adj @ support   (f32 output, direct accumulation)
# ---------------------------------------------------------------------------

def _aggregate_kernel_tiled(adj_ref, sup_ref, o_ref):
    # support tiled per reduction step; adj cast f32->bf16 in-kernel.
    k = pl.program_id(2)

    @pl.when(k == 0)
    def _():
        o_ref[...] = jnp.zeros_like(o_ref)

    o_ref[...] += jnp.dot(adj_ref[...].astype(jnp.bfloat16), sup_ref[...],
                          preferred_element_type=jnp.float32)


def _aggregate_kernel_resident(adj_ref, sup_ref, o_ref, *, tk):
    # support is fully VMEM-resident (all Np rows); slice the reduction window.
    k = pl.program_id(2)

    @pl.when(k == 0)
    def _():
        o_ref[...] = jnp.zeros_like(o_ref)

    start = pl.multiple_of(k * tk, tk)
    sup_blk = sup_ref[pl.ds(start, tk), :]
    o_ref[...] += jnp.dot(adj_ref[...].astype(jnp.bfloat16), sup_blk,
                          preferred_element_type=jnp.float32)


# ---------------------------------------------------------------------------
# Helpers
# ---------------------------------------------------------------------------

def _round_up(x, m):
    return ((x + m - 1) // m) * m


def _pick_tile(dim, candidates, min_programs=1):
    """Largest candidate dividing `dim` that yields >= min_programs grid steps,
    falling back to the largest divisor found, then to `dim` itself."""
    fallback = None
    for c in candidates:
        if dim % c == 0:
            if fallback is None:
                fallback = c
            if dim // c >= min_programs:
                return c
    return fallback if fallback is not None else dim


def _pad2d(a, rows, cols):
    r, c = a.shape
    if r == rows and c == cols:
        return a
    return jnp.pad(a, ((0, rows - r), (0, cols - c)))


# ---------------------------------------------------------------------------
# Wrapper
# ---------------------------------------------------------------------------

def graph_convolution(x, adj, w_t, b):
    """GCN layer forward: adj @ (x @ w_t + b).

    x:   [N, Fin]    float32
    adj: [N, N]      float32
    w_t: [Fin, Fout] float32 (pre-transposed weight, i.e. W.T)
    b:   [Fout] or [1, Fout] float32
    Returns [N, Fout] in x.dtype.
    """
    N, Fin = x.shape
    Fout = w_t.shape[1]
    out_dtype = x.dtype
    mxu_dtype = jnp.bfloat16  # support storage / MXU input dtype

    # Lane/sublane-dense padded shapes (128-multiples). No wrapper-side bf16 cast:
    # all MXU-input casts happen in-kernel (halves adj/x traffic end-to-end).
    Np = _round_up(N, 128)
    Fip = _round_up(Fin, 128)
    Fop = _round_up(Fout, 128)

    xp = _pad2d(x.astype(jnp.float32), Np, Fip)
    wp = _pad2d(w_t.astype(jnp.float32), Fip, Fop)
    bp = _pad2d(jnp.asarray(b, jnp.float32).reshape(1, -1), 1, Fop)
    ap = _pad2d(adj.astype(jnp.float32), Np, Np)
    # Padding invariant: padded x rows give support == bias, but the matching adj
    # columns are zero, so padded rows/cols never contaminate the real output.

    # ---------------- pass 1: support = x @ W^T + b (computed once) ----------------
    tm_s = _pick_tile(Np, (512, 256, 128), min_programs=2)
    tn_s = _pick_tile(Fop, (512, 256, 128))

    if Fip <= 2048:
        support = pl.pallas_call(
            _support_kernel_single,
            out_shape=jax.ShapeDtypeStruct((Np, Fop), mxu_dtype),
            grid_spec=pltpu.PrefetchScalarGridSpec(
                num_scalar_prefetch=0,
                grid=(Np // tm_s, Fop // tn_s),
                in_specs=[
                    pl.BlockSpec((tm_s, Fip), lambda i, j: (i, 0)),
                    pl.BlockSpec((Fip, tn_s), lambda i, j: (0, j)),
                    pl.BlockSpec((1, tn_s), lambda i, j: (0, j)),
                ],
                out_specs=pl.BlockSpec((tm_s, tn_s), lambda i, j: (i, j)),
            ),
            compiler_params=pltpu.CompilerParams(
                dimension_semantics=("parallel", "parallel"),
                vmem_limit_bytes=VMEM_LIMIT_BYTES,
            ),
        )(xp, wp, bp)
    else:
        # Wide-feature guard: reduction-last tiling keeps VMEM bounded.
        tk_s = _pick_tile(Fip, (2048, 1024, 512, 256, 128))
        support = pl.pallas_call(
            _support_kernel_reduce,
            out_shape=jax.ShapeDtypeStruct((Np, Fop), mxu_dtype),
            grid_spec=pltpu.PrefetchScalarGridSpec(
                num_scalar_prefetch=0,
                grid=(Np // tm_s, Fop // tn_s, Fip // tk_s),
                in_specs=[
                    pl.BlockSpec((tm_s, tk_s), lambda i, j, k: (i, k)),
                    pl.BlockSpec((tk_s, tn_s), lambda i, j, k: (k, j)),
                    pl.BlockSpec((1, tn_s), lambda i, j, k: (0, j)),
                ],
                out_specs=pl.BlockSpec((tm_s, tn_s), lambda i, j, k: (i, j)),
                scratch_shapes=[pltpu.VMEM((tm_s, tn_s), jnp.float32)],
            ),
            compiler_params=pltpu.CompilerParams(
                dimension_semantics=("parallel", "parallel", "arbitrary"),
                vmem_limit_bytes=VMEM_LIMIT_BYTES,
            ),
        )(xp, wp, bp)

    # ---------------- pass 2: output = adj @ support ----------------
    sup_bytes = Np * Fop * jnp.dtype(mxu_dtype).itemsize
    resident = sup_bytes <= 8 * 1024 * 1024  # fits VMEM (double-buffered) on all gens

    # tn: cover full padded Fout when it fits -> grid[1] == 1 -> adj streamed once.
    tn = _pick_tile(Fop, (512, 256, 128))
    # tk: large reduction tile -> amortize per-step overhead, long DMA bursts.
    tk = _pick_tile(Np, (1024, 512, 256, 128))
    # tm: when support is resident its traffic is tm-independent, so prefer >=2
    # programs on the leading parallel axis (megacore on v7x); otherwise maximize
    # tm to cut support re-reads.
    tm = _pick_tile(Np, (512, 256, 128), min_programs=2 if resident else 1)

    grid = (Np // tm, Fop // tn, Np // tk)
    n_k = grid[2]
    deep = n_k > 2  # only deepen buffering when the reduction can actually pipeline

    if deep:
        adj_spec = pl.BlockSpec((tm, tk), lambda i, j, k: (i, k),
                                pipeline_mode=pl.Buffered(3))
    else:
        adj_spec = pl.BlockSpec((tm, tk), lambda i, j, k: (i, k))

    if resident:
        # Full support rows VMEM-resident; block index constant over k.
        sup_spec = pl.BlockSpec((Np, tn), lambda i, j, k: (0, j))
        kernel = functools.partial(_aggregate_kernel_resident, tk=tk)
    else:
        if deep:
            sup_spec = pl.BlockSpec((tk, tn), lambda i, j, k: (k, j),
                                    pipeline_mode=pl.Buffered(3))
        else:
            sup_spec = pl.BlockSpec((tk, tn), lambda i, j, k: (k, j))
        kernel = _aggregate_kernel_tiled

    # Truthful traffic estimate (adj re-read grid[1]x, support re-read grid[0]x
    # unless resident), so XLA schedules neighbors around this mem-bound call well.
    adj_traffic = 4 * Np * Np * grid[1]
    sup_traffic = 2 * Np * Fop * (1 if resident else grid[0])
    out_traffic = 4 * Np * Fop
    cost = pl.CostEstimate(
        flops=2 * Np * Np * Fop,
        transcendentals=0,
        bytes_accessed=adj_traffic + sup_traffic + out_traffic,
    )

    out = pl.pallas_call(
        kernel,
        out_shape=jax.ShapeDtypeStruct((Np, Fop), jnp.float32),
        grid_spec=pltpu.PrefetchScalarGridSpec(
            num_scalar_prefetch=0,
            grid=grid,
            in_specs=[adj_spec, sup_spec],
            out_specs=pl.BlockSpec((tm, tn), lambda i, j, k: (i, j)),
        ),
        compiler_params=pltpu.CompilerParams(
            dimension_semantics=("parallel", "parallel", "arbitrary"),
            vmem_limit_bytes=VMEM_LIMIT_BYTES,
        ),
        cost_estimate=cost,
    )(ap, support)

    # Slice the padded result back to the logical shape.
    return out[:N, :Fout].astype(out_dtype)


# ---------------------------------------------------------------------------
# Demo / correctness check
# ---------------------------------------------------------------------------

if __name__ == "__main__":
    # Small shapes consistent with the module's forward.
    N = 16            # number of graph nodes
    IN_FEATURES = 32
    OUT_FEATURES = 64

    key = jax.random.PRNGKey(0)
    k_x, k_adj, k_w, k_b = jax.random.split(key, 4)

    # Deterministic parameter init matching the module:
    #   stdv = 1/sqrt(in_features); W.weight ~ U(-stdv, stdv)
    #   nn.Linear bias default init ~ U(-1/sqrt(in_features), 1/sqrt(in_features))
    stdv = 1.0 / math.sqrt(IN_FEATURES)
    weight = jax.random.uniform(
        k_w, (OUT_FEATURES, IN_FEATURES), jnp.float32, minval=-stdv, maxval=stdv
    )
    bias = jax.random.uniform(
        k_b, (OUT_FEATURES,), jnp.float32, minval=-stdv, maxval=stdv
    )

    x = jax.random.normal(k_x, (N, IN_FEATURES), jnp.float32)
    # Symmetric synthetic adjacency.
    a = jax.random.uniform(k_adj, (N, N), jnp.float32)
    adj = (a + a.T) * 0.5

    w_t = weight.T                      # [Fin, Fout]

    out = graph_convolution(x, adj, w_t, bias)
    out = jax.block_until_ready(out)
    assert out.shape == (N, OUT_FEATURES)

    # Reference 1: same bf16 MXU rounding path as the kernel -> tight tolerance.
    sup_ref = jnp.dot(
        x.astype(jnp.bfloat16), w_t.astype(jnp.bfloat16),
        preferred_element_type=jnp.float32,
    ) + bias.reshape(1, -1)
    ref_bf16 = jnp.dot(
        adj.astype(jnp.bfloat16), sup_ref.astype(jnp.bfloat16),
        preferred_element_type=jnp.float32,
    )
    assert jnp.allclose(out, ref_bf16, atol=2e-3, rtol=2e-3)

    # Reference 2: full f32 semantics of the PyTorch module -> loose tolerance
    # (difference is only the bf16 MXU-input quantization).
    ref_f32 = adj @ (x @ w_t + bias.reshape(1, -1))
    assert jnp.allclose(out, ref_f32, atol=2e-1, rtol=1e-1)

    print("KERNEL_OK")
</pallas_src>

<mosaic_0001>
module attributes {stable_mosaic.version = 11 : i64} {
  func.func @_support_kernel_single(%arg0: i32, %arg1: i32, %arg2: memref<128x128xf32, #tpu.memory_space<vmem>>, %arg3: memref<128x128xf32, #tpu.memory_space<vmem>>, %arg4: memref<1x128xf32, #tpu.memory_space<vmem>>, %arg5: memref<128x128xbf16, #tpu.memory_space<vmem>>) attributes {dimension_semantics = [#tpu.dimension_semantics<parallel>, #tpu.dimension_semantics<parallel>], iteration_bounds = array<i64: 1, 1>, scalar_prefetch = 0 : i64, scratch_operands = 0 : i64, tpu.core_type = #tpu.core_type<tc>, window_params = [{transform_indices = @transform_0, window_bounds = array<i64: 128, 128>}, {transform_indices = @transform_1, window_bounds = array<i64: 128, 128>}, {transform_indices = @transform_2, window_bounds = array<i64: 1, 128>}, {transform_indices = @transform_3, window_bounds = array<i64: 128, 128>}]} {
    %c0 = arith.constant 0 : index
    %c0_0 = arith.constant 0 : index
    %0 = vector.load %arg2[%c0, %c0_0] : memref<128x128xf32, #tpu.memory_space<vmem>>, vector<128x128xf32>
    %1 = arith.truncf %0 : vector<128x128xf32> to vector<128x128xbf16>
    %c0_1 = arith.constant 0 : index
    %c0_2 = arith.constant 0 : index
    %2 = vector.load %arg3[%c0_1, %c0_2] : memref<128x128xf32, #tpu.memory_space<vmem>>, vector<128x128xf32>
    %3 = arith.truncf %2 : vector<128x128xf32> to vector<128x128xbf16>
    %cst = arith.constant dense<0.000000e+00> : vector<128x128xf32>
    %4 = tpu.matmul %1, %3, %cst {dimension_numbers = #tpu.dot_dimension_numbers<[1], [0], [0], [1], [0, 0, 1, 1], [], []>} : vector<128x128xbf16>, vector<128x128xbf16>, vector<128x128xf32> -> vector<128x128xf32>
    %c0_3 = arith.constant 0 : index
    %c0_4 = arith.constant 0 : index
    %5 = vector.load %arg4[%c0_3, %c0_4] : memref<1x128xf32, #tpu.memory_space<vmem>>, vector<1x128xf32>
    %6 = vector.broadcast %5 : vector<1x128xf32> to vector<128x128xf32>
    %7 = arith.addf %4, %6 : vector<128x128xf32>
    %8 = arith.truncf %7 : vector<128x128xf32> to vector<128x128xbf16>
    %c0_5 = arith.constant 0 : index
    %c0_6 = arith.constant 0 : index
    %9 = vector.load %arg5[%c0_5, %c0_6] : memref<128x128xbf16, #tpu.memory_space<vmem>>, vector<128x128xbf16>
    tpu.vector_store %arg5[%c0_5, %c0_6], %8 {strides = array<i32>} : memref<128x128xbf16, #tpu.memory_space<vmem>>, vector<128x128xbf16>,
    return
  }
  func.func @transform_0(%arg0: i32, %arg1: i32) -> (i32, i32) {
    %c0_i32 = arith.constant 0 : i32
    %c0_i32_0 = arith.constant 0 : i32
    return %arg0, %c0_i32 : i32, i32
  }
  func.func @transform_1(%arg0: i32, %arg1: i32) -> (i32, i32) {
    %c0_i32 = arith.constant 0 : i32
    %c0_i32_0 = arith.constant 0 : i32
    return %c0_i32, %arg1 : i32, i32
  }
  func.func @transform_2(%arg0: i32, %arg1: i32) -> (i32, i32) {
    %c0_i32 = arith.constant 0 : i32
    %c0_i32_0 = arith.constant 0 : i32
    return %c0_i32, %arg1 : i32, i32
  }
  func.func @transform_3(%arg0: i32, %arg1: i32) -> (i32, i32) {
    %c0_i32 = arith.constant 0 : i32
    return %arg0, %arg1 : i32, i32
  }
}

</mosaic_0001>

<bundles_post_ra>
// kernel: tpu_custom_call.1
= control target key start
LH: loop header
LB: loop body
LE: loop exit
PB: predicated region body
PF: predicated region fallthrough
CT: control target
= control target key end

     0   :  { %8 = vsyncpa [#allocation3], 0  ;;  %s583_s0 = inlined_call_operand.hbm [shape: f32[128,128], index: 0, kind: input, shape index: {}]   ;;  %s584_s1 = inlined_call_operand.hbm [shape: f32[128,128], index: 1, kind: input, shape index: {}]   ;;  %s585_s2 = inlined_call_operand.vmem [shape: f32[1,128], index: 2, kind: input, shape index: {}]   ;;  %s586_s3 = inlined_call_operand.hbm [shape: bf16[128,128], index: 3, kind: output, shape index: {}]  }
   0x1   :  { %9 = vsyncpa [#allocation6], 0 }
   0x2   :  { %10 = vsyncpa [#allocation4], 0  ;;  %s517_s12 = smov [#allocation2]   ;;  %s445_s16 = scalar_lea.hbm %s583_s0, 2048 }
   0x3   :  { %s16_s13 = sshll.u32 %s517_s12, 4  ;;  %p446_p0 = scmp.ne.s32.totalorder %s583_s0, %s445_s16  ;;  %s17_s13 = int_to_ptr.vmem [resolvable:$true] %s16_s13 }
   0x4   :  { %p449_p1 = scmp.lt.u32.totalorder %s445_s16, %s583_s0 }
   0x6   :  { %p451_p2 = pnand %p449_p1, %p446_p0 }
   0x8   :  { %454 = shalt.err (!%p451_p2)
}
   0x9   :  { %s455_s21 = scalar_lea.vmem %s17_s13, 2048  ;;  %p460_p4 = scmp.lt.s32.totalorder %s17_s13, %s17_s13 }
   0xa   :  { %p456_p3 = scmp.ne.s32.totalorder %s17_s13, %s455_s21  ;;  %p461_p5 = scmp.lt.s32.totalorder %s455_s21, %s455_s21 }
   0xc   :  { %p462_p6 = por %p461_p5, %p460_p4 }
   0xe   :  { %p463_p7 = pnand %p462_p6, %p456_p3 }
  0x10   :  { %466 = shalt.err (!%p463_p7)
}
  0x11   :  { %s518_s22 = smov 128   ;;  %s519_s23 = smov 8  }
  0x12   :  { %22 = dma.hbm_to_vmem [thread:$0]  %s583_s0, 2048, %s17_s13, [#allocation3], %s518_s22, %s518_s22, %s519_s23  }
  0x13   :  { %s520_s26 = smov [#allocation5]   ;;  %s467_s30 = scalar_lea.hbm %s584_s1, 2048 }
  0x14   :  { %s28_s27 = sshll.u32 %s520_s26, 4  ;;  %p468_p8 = scmp.ne.s32.totalorder %s584_s1, %s467_s30  ;;  %s29_s27 = int_to_ptr.vmem [resolvable:$true] %s28_s27 }
  0x15   :  { %p471_p9 = scmp.lt.u32.totalorder %s467_s30, %s584_s1 }
  0x17   :  { %p473_p10 = pnand %p471_p9, %p468_p8 }
  0x19   :  { %476 = shalt.err (!%p473_p10)
}
  0x1a   :  { %s477_s8 = scalar_lea.vmem %s29_s27, 2048  ;;  %p482_p12 = scmp.lt.s32.totalorder %s29_s27, %s29_s27 }
  0x1b   :  { %p478_p11 = scmp.ne.s32.totalorder %s29_s27, %s477_s8  ;;  %p483_p13 = scmp.lt.s32.totalorder %s477_s8, %s477_s8 }
  0x1d   :  { %p484_p0 = por %p483_p13, %p482_p12 }
  0x1f   :  { %p485_p1 = pnand %p484_p0, %p478_p11 }
  0x21   :  { %488 = shalt.err (!%p485_p1)
}
  0x22   :  { %34 = dma.hbm_to_vmem [thread:$0]  %s584_s1, 2048, %s29_s27, [#allocation6], %s518_s22, %s518_s22, %s519_s23  }
  0x23   :  { %511 = dma.done.wait [#allocation3], 2048  }
  0x24   :  { %512 = vsyncadd [#allocation3], 4294965248 }
  0x25   :  { %513 = dma.done.wait [#allocation6], 2048  }
  0x26   :  { %514 = vsyncadd [#allocation6], 4294965248  ;;  %v68_v0 = vld [vmem:[#allocation5] sm:$0xff]  ;;  %v69_v1 = vld [vmem:[#allocation5 + $0x8] sm:$0xff] }
  0x27   :  { %v70_v2 = vld [vmem:[#allocation5 + $0x10] sm:$0xff]  ;;  %v84_v3 = vpack.c.bf16 %v69_v1, %v68_v0  ;;  %v71_v4 = vld [vmem:[#allocation5 + $0x18] sm:$0xff]  ;;  %v72_v6 = vld [vmem:[#allocation5 + $0x20] sm:$0xff] }
  0x28   :  { %v85_v5 = vpack.c.bf16 %v71_v4, %v70_v2  ;;  %v73_v7 = vld [vmem:[#allocation5 + $0x28] sm:$0xff]  ;;  %v74_v9 = vld [vmem:[#allocation5 + $0x30] sm:$0xff]  ;;  %v44_v10 = vld [vmem:[#allocation2] sm:$0xff] }
  0x29   :  { %390 = vmatprep.subr.bf16.mxu0 %v84_v3  ;;  %422 = vmatprep.subr.bf16.mxu1 %v84_v3  ;;  %v86_v8 = vpack.c.bf16 %v73_v7, %v72_v6  ;;  %v45_v11 = vld [vmem:[#allocation2 + $0x8] sm:$0xff]  ;;  %v75_v12 = vld [vmem:[#allocation5 + $0x38] sm:$0xff]  ;;  %v52_v14 = vld [vmem:[#allocation2 + $0x40] sm:$0xff] }
  0x2a   :  { %391 = vmatpush3.bf16.msra.mxu0 %v84_v3  ;;  %430 = vmatpush3.bf16.msra.mxu1 %v84_v3  ;;  %v60_v13 = vpack.c.bf16 %v45_v11, %v44_v10  ;;  %v53_v15 = vld [vmem:[#allocation2 + $0x48] sm:$0xff]  ;;  %v87_v17 = vpack.c.bf16 %v75_v12, %v74_v9  ;;  %v76_v18 = vld [vmem:[#allocation5 + $0x40] sm:$0xff]  ;;  %v78_v21 = vld [vmem:[#allocation5 + $0x50] sm:$0xff] }
  0x2b   :  { %392 = vmatprep.subr.bf16.mxu0 %v85_v5  ;;  %423 = vmatprep.subr.bf16.mxu1 %v85_v5  ;;  %v64_v16 = vpack.c.bf16 %v53_v15, %v52_v14  ;;  %v77_v19 = vld [vmem:[#allocation5 + $0x48] sm:$0xff]  ;;  %v79_v22 = vld [vmem:[#allocation5 + $0x58] sm:$0xff]  ;;  %v80_v24 = vld [vmem:[#allocation5 + $0x60] sm:$0xff] }
  0x2c   :  { %406 = vmatprep.mubr.bf16.mxu0 %v60_v13  ;;  %v88_v20 = vpack.c.bf16 %v77_v19, %v76_v18  ;;  %v89_v23 = vpack.c.bf16 %v79_v22, %v78_v21  ;;  %v81_v25 = vld [vmem:[#allocation5 + $0x68] sm:$0xff]  ;;  %v82_v27 = vld [vmem:[#allocation5 + $0x70] sm:$0xff]  ;;  %v83_v28 = vld [vmem:[#allocation5 + $0x78] sm:$0xff] }
  0x2d   :  { %414 = vmatprep.mubr.bf16.mxu1 %v64_v16  ;;  %v90_v26 = vpack.c.bf16 %v81_v25, %v80_v24  ;;  %v91_v29 = vpack.c.bf16 %v83_v28, %v82_v27  ;;  %v46_v30 = vld [vmem:[#allocation2 + $0x10] sm:$0xff]  ;;  %v47_v31 = vld [vmem:[#allocation2 + $0x18] sm:$0xff]  ;;  %v48_v34 = vld [vmem:[#allocation2 + $0x20] sm:$0xff] }
  0x2e   :  { %393 = vmatpush3.bf16.msra.mxu0 %v85_v5  ;;  %431 = vmatpush3.bf16.msra.mxu1 %v85_v5  ;;  %v54_v32 = vld [vmem:[#allocation2 + $0x50] sm:$0xff]  ;;  %v55_v33 = vld [vmem:[#allocation2 + $0x58] sm:$0xff]  ;;  %v49_v35 = vld [vmem:[#allocation2 + $0x28] sm:$0xff]  ;;  %v61_v38 = vpack.c.bf16 %v47_v31, %v46_v30 }
  0x2f   :  { %394 = vmatprep.subr.bf16.mxu0 %v86_v8  ;;  %424 = vmatprep.subr.bf16.mxu1 %v86_v8  ;;  %v56_v36 = vld [vmem:[#allocation2 + $0x60] sm:$0xff]  ;;  %v57_v37 = vld [vmem:[#allocation2 + $0x68] sm:$0xff]  ;;  %v65_v39 = vpack.c.bf16 %v55_v33, %v54_v32  ;;  %v62_v40 = vpack.c.bf16 %v49_v35, %v48_v34  ;;  %v50_v42 = vld [vmem:[#allocation2 + $0x30] sm:$0xff] }
  0x30   :  { %v66_v41 = vpack.c.bf16 %v57_v37, %v56_v36  ;;  %v51_v43 = vld [vmem:[#allocation2 + $0x38] sm:$0xff]  ;;  %v58_v44 = vld [vmem:[#allocation2 + $0x70] sm:$0xff]  ;;  %v294_v49 = vld [vmem:[%s585_s2] ss:$0 sm:$0xff]  ;;  %s521_s2 = smov [#allocation7]  }
  0x31   :  { %v59_v45 = vld [vmem:[#allocation2 + $0x78] sm:$0xff]  ;;  %v63_v46 = vpack.c.bf16 %v51_v43, %v50_v42  ;;  %s281_s11 = sshll.u32 %s521_s2, 4  ;;  %s282_s11 = int_to_ptr.vmem [resolvable:$true] %s281_s11 }
  0x32   :  { %395 = vmatpush3.bf16.msra.mxu0 %v86_v8  ;;  %432 = vmatpush3.bf16.msra.mxu1 %v86_v8  ;;  %v67_v47 = vpack.c.bf16 %v59_v45, %v58_v44  ;;  %s489_s12 = scalar_lea.vmem %s282_s11, 1024  ;;  %p494_p3 = scmp.lt.s32.totalorder %s282_s11, %s282_s11 }
  0x33   :  { %396 = vmatprep.subr.bf16.mxu0 %v87_v17  ;;  %425 = vmatprep.subr.bf16.mxu1 %v87_v17  ;;  %p490_p2 = scmp.ne.s32.totalorder %s282_s11, %s489_s12  ;;  %p495_p4 = scmp.lt.s32.totalorder %s489_s12, %s489_s12 }
  0x35   :  { %p496_p5 = por %p495_p4, %p494_p3 }
  0x36   :  { %397 = vmatpush3.bf16.msra.mxu0 %v87_v17  ;;  %433 = vmatpush3.bf16.msra.mxu1 %v87_v17 }
  0x37   :  { %398 = vmatprep.subr.bf16.mxu0 %v88_v20  ;;  %426 = vmatprep.subr.bf16.mxu1 %v88_v20  ;;  %p497_p6 = pnand %p496_p5, %p490_p2 }
  0x3a   :  { %399 = vmatpush3.bf16.msra.mxu0 %v88_v20  ;;  %434 = vmatpush3.bf16.msra.mxu1 %v88_v20 }
  0x3b   :  { %400 = vmatprep.subr.bf16.mxu0 %v89_v23  ;;  %427 = vmatprep.subr.bf16.mxu1 %v89_v23 }
  0x3e   :  { %401 = vmatpush3.bf16.msra.mxu0 %v89_v23  ;;  %435 = vmatpush3.bf16.msra.mxu1 %v89_v23 }
  0x3f   :  { %402 = vmatprep.subr.bf16.mxu0 %v90_v26  ;;  %428 = vmatprep.subr.bf16.mxu1 %v90_v26 }
  0x42   :  { %403 = vmatpush3.bf16.msra.mxu0 %v90_v26  ;;  %436 = vmatpush3.bf16.msra.mxu1 %v90_v26 }
  0x43   :  { %404 = vmatprep.subr.bf16.mxu0 %v91_v29  ;;  %429 = vmatprep.subr.bf16.mxu1 %v91_v29 }
  0x46   :  { %405 = vmatpush3.bf16.msra.mxu0 %v91_v29  ;;  %437 = vmatpush3.bf16.msra.mxu1 %v91_v29 }
  0x49   :  { %407 = vmatmul.mubr.bf16.vlgmr.msra.gmra.mrb[0].mxu0 %v61_v38  ;;  %415 = vmatmul.mubr.bf16.vlgmr.msra.gmra.mrb[0].mxu1 %v65_v39 }
  0x4a   :  { %410 = vmatprep.mubr.bf16.mxu0 %v62_v40  ;;  %418 = vmatprep.mubr.bf16.mxu1 %v66_v41 }
  0x51   :  { %411 = vmatmul.mubr.bf16.gmra.mrb[4].mxu0 %v63_v46  ;;  %419 = vmatmul.mubr.bf16.gmra.mrb[4].mxu1 %v67_v47 }
 0x11c   :  { %v408_v48 = vpop.f32.mrb[0].mxu0  ;;  %v416_v50 = vpop.f32.mrb[0].mxu1 }
 0x11d   :  { %v133_v51 = vpop.f32.mrb[1].mxu0  ;;  %v165_v52 = vpop.f32.mrb[1].mxu1  ;;  %v142_v55 = vadd.f32 %v408_v48, %v294_v49  ;;  %v174_v56 = vadd.f32 %v416_v50, %v294_v49 }
 0x11e   :  { %v409_v53 = vpop.f32.mrb[2].mxu0  ;;  %v417_v54 = vpop.f32.mrb[2].mxu1  ;;  %v134_v61 = vadd.f32 %v294_v49, %v133_v51  ;;  %v166_v62 = vadd.f32 %v294_v49, %v165_v52 }
 0x11f   :  { %v145_v57 = vadd.f32 %v409_v53, %v294_v49  ;;  %v177_v58 = vadd.f32 %v417_v54, %v294_v49  ;;  %v136_v59 = vpop.f32.mrb[3].mxu0  ;;  %v168_v60 = vpop.f32.mrb[3].mxu1 }
 0x120   :  { %v137_v63 = vadd.f32 %v294_v49, %v136_v59  ;;  %v169_v0 = vadd.f32 %v294_v49, %v168_v60 }
 0x121   :  { %v335_v1 = vpack.c.bf16 %v145_v57, %v142_v55  ;;  %v355_v2 = vpack.c.bf16 %v177_v58, %v174_v56 }
 0x122   :  { %v330_v3 = vpack.c.bf16 %v137_v63, %v134_v61  ;;  %v350_v4 = vpack.c.bf16 %v169_v0, %v166_v62 }
 0x123   :  { %367 = vst [vmem:[#allocation7 + $0x8] sm:$0xff] %v335_v1   ;;  %371 = vst [vmem:[#allocation7 + $0x28] sm:$0xff] %v355_v2  }
 0x124   :  { %331 = vst [vmem:[#allocation7] sm:$0xff] %v330_v3   ;;  %370 = vst [vmem:[#allocation7 + $0x20] sm:$0xff] %v350_v4   ;;  %v412_v5 = vpop.f32.mrb[4].mxu0  ;;  %v420_v6 = vpop.f32.mrb[4].mxu1 }
 0x125   :  { %v149_v7 = vpop.f32.mrb[5].mxu0  ;;  %v181_v8 = vpop.f32.mrb[5].mxu1  ;;  %v158_v11 = vadd.f32 %v412_v5, %v294_v49  ;;  %v190_v12 = vadd.f32 %v420_v6, %v294_v49 }
 0x126   :  { %v413_v9 = vpop.f32.mrb[6].mxu0  ;;  %v421_v10 = vpop.f32.mrb[6].mxu1  ;;  %v150_v17 = vadd.f32 %v294_v49, %v149_v7  ;;  %v182_v18 = vadd.f32 %v294_v49, %v181_v8 }
 0x127   :  { %v161_v13 = vadd.f32 %v413_v9, %v294_v49  ;;  %v193_v14 = vadd.f32 %v421_v10, %v294_v49  ;;  %v152_v15 = vpop.f32.mrb[7].mxu0  ;;  %v184_v16 = vpop.f32.mrb[7].mxu1 }
 0x128   :  { %v153_v19 = vadd.f32 %v294_v49, %v152_v15  ;;  %v185_v20 = vadd.f32 %v294_v49, %v184_v16 }
 0x129   :  { %v345_v21 = vpack.c.bf16 %v161_v13, %v158_v11  ;;  %v365_v22 = vpack.c.bf16 %v193_v14, %v190_v12 }
 0x12a   :  { %v340_v23 = vpack.c.bf16 %v153_v19, %v150_v17  ;;  %v360_v24 = vpack.c.bf16 %v185_v20, %v182_v18 }
 0x12b   :  { %369 = vst [vmem:[#allocation7 + $0x18] sm:$0xff] %v345_v21   ;;  %373 = vst [vmem:[#allocation7 + $0x38] sm:$0xff] %v365_v22  }
 0x12c   :  { %368 = vst [vmem:[#allocation7 + $0x10] sm:$0xff] %v340_v23   ;;  %372 = vst [vmem:[#allocation7 + $0x30] sm:$0xff] %v360_v24  }
 0x12d   :  { %500 = shalt.err (!%p497_p6)
}
 0x12e   :  { %s501_s15 = scalar_lea.hbm %s586_s3, 1024 }
 0x12f   :  { %p502_p7 = scmp.ne.s32.totalorder %s586_s3, %s501_s15  ;;  %p505_p8 = scmp.lt.u32.totalorder %s501_s15, %s586_s3 }
 0x131   :  { %p507_p9 = pnand %p505_p8, %p502_p7 }
 0x133   :  { %510 = shalt.err (!%p507_p9)
}
 0x134   :  { %s522_s20 = smov 64   ;;  %s523_s21 = smov 4  }
 0x135   :  { %287 = dma.vmem_to_hbm [thread:$0]  %s282_s11, 1024, %s586_s3, [#allocation4], %s522_s20, %s522_s20, %s523_s21  }
 0x136   :  { %515 = dma.done.wait [#allocation4], 1024  }
 0x137   :  { %516 = vsyncadd [#allocation4], 4294966272 }
 0x138   :  { %291 = vsyncpa [#allocation3], 1 }
 0x139   :  { %292 = vsyncpa [#allocation6], 1 }
 0x13a   :  { %293 = vsyncpa [#allocation4], 1 }

</bundles_post_ra>
